<compile_context>
chip_gen: v5e
topology: v5e:2x2
jax: 0.10.0
libtpu: 0.0.40
codegen_flags: <defaults>
</compile_context>

<pallas_src>
import jax
import jax.numpy as jnp
import numpy as np
from jax.experimental import pallas as pl
from jax.experimental.pallas import tpu as pltpu

SKATER_STATS = 30
GOALIE_STATS = 12
SKATER_RED = SKATER_STATS // 3        # 10
GOALIE_RED = GOALIE_STATS // 3        # 4
NUM_CLASSES = 3
FEAT_LEN = 2 * (SKATER_RED + GOALIE_RED)   # 28  == self.stat_len


# ---------------- fused Pallas kernel ----------------

def _fused_kernel(sk_ref, go_ref, wsk_ref, wgo_ref, wl_sk_ref, wl_go_ref,
                  b_ref, o_ref):
    # sk_ref: (tb, 2*P_s*30)   go_ref: (tb, 2*P_g*12)   (team-flattened lanes)
    # wsk_ref: (2*P_s*30, 20)  wgo_ref: (2*P_g*12, 8)   (block-diag, mean folded)
    # wl_sk_ref: (20, 3)  wl_go_ref: (8, 3)             (classifier row blocks)
    # b_ref: (1, 31) = [bsk(team0)|bsk(team1) | bgo(t0)|bgo(t1) | lin_b]
    b = b_ref[...]
    b_sk = b[:, : 2 * SKATER_RED]                                   # (1, 20)
    b_go = b[:, 2 * SKATER_RED: 2 * (SKATER_RED + GOALIE_RED)]      # (1, 8)
    b_lin = b[:, 2 * (SKATER_RED + GOALIE_RED):]                    # (1, 3)

    sk = sk_ref[...].astype(jnp.float32)
    go = go_ref[...].astype(jnp.float32)

    # mean over players is folded into the (tiled / P) weights; block-diagonal
    # columns give [team0 feats | team1 feats] in one MXU pass per position.
    f_sk = jnp.tanh(
        jnp.dot(sk, wsk_ref[...], preferred_element_type=jnp.float32) + b_sk)
    f_go = jnp.tanh(
        jnp.dot(go, wgo_ref[...], preferred_element_type=jnp.float32) + b_go)

    # Linear(28 -> 3) decomposed over its contraction dimension: identical to
    # tanh(concat(features)) @ lin_w.T + lin_b, without any in-kernel concat.
    o_ref[...] = (
        jnp.dot(f_sk, wl_sk_ref[...], preferred_element_type=jnp.float32)
        + jnp.dot(f_go, wl_go_ref[...], preferred_element_type=jnp.float32)
        + b_lin
    ).astype(o_ref.dtype)


# ---------------- parameters ----------------

def init_params(key):
    ks = jax.random.split(key, 6)

    def unif(k, shape, fan_in):
        bound = 1.0 / np.sqrt(fan_in)
        return jax.random.uniform(k, shape, jnp.float32, -bound, bound)

    return {
        "conv_skater_w": unif(ks[0], (SKATER_RED, SKATER_STATS), SKATER_STATS),
        "conv_skater_b": unif(ks[1], (SKATER_RED,), SKATER_STATS),
        "conv_goalie_w": unif(ks[2], (GOALIE_RED, GOALIE_STATS), GOALIE_STATS),
        "conv_goalie_b": unif(ks[3], (GOALIE_RED,), GOALIE_STATS),
        "lin_w": unif(ks[4], (NUM_CLASSES, FEAT_LEN), FEAT_LEN),
        "lin_b": unif(ks[5], (NUM_CLASSES,), FEAT_LEN),
    }


def pack_params(params, n_skaters, n_goalies):
    """One-time weight packing (layout plumbing kept out of the hot path)."""
    # Fold the player mean into the conv weights and tile over the P players
    # of the flattened (player, stat) lane axis.
    wsk_unit = params["conv_skater_w"].T / float(n_skaters)       # (30, 10)
    wgo_unit = params["conv_goalie_w"].T / float(n_goalies)       # (12, 4)
    wsk_team = jnp.tile(wsk_unit, (n_skaters, 1))                  # (P_s*30, 10)
    wgo_team = jnp.tile(wgo_unit, (n_goalies, 1))                  # (P_g*12, 4)
    zs = jnp.zeros_like(wsk_team)
    zg = jnp.zeros_like(wgo_team)
    # Block-diagonal over the two teams: cols [0:R)=team0, [R:2R)=team1.
    wsk_big = jnp.concatenate(
        [jnp.concatenate([wsk_team, zs], axis=1),
         jnp.concatenate([zs, wsk_team], axis=1)], axis=0)         # (2*P_s*30, 20)
    wgo_big = jnp.concatenate(
        [jnp.concatenate([wgo_team, zg], axis=1),
         jnp.concatenate([zg, wgo_team], axis=1)], axis=0)         # (2*P_g*12, 8)

    # Classifier rows re-ordered to match [sk-t0|sk-t1] and [go-t0|go-t1].
    wlin_t = params["lin_w"].T                                     # (28, 3)
    c0 = SKATER_RED
    c1 = SKATER_RED + GOALIE_RED
    c2 = 2 * SKATER_RED + GOALIE_RED
    wl_sk = jnp.concatenate([wlin_t[:c0], wlin_t[c1:c2]], axis=0)  # (20, 3)
    wl_go = jnp.concatenate([wlin_t[c0:c1], wlin_t[c2:]], axis=0)  # (8, 3)

    biases = jnp.concatenate([
        jnp.tile(params["conv_skater_b"], 2),                      # 20
        jnp.tile(params["conv_goalie_b"], 2),                      # 8
        params["lin_b"],                                           # 3
    ]).reshape(1, -1)                                              # (1, 31)

    return {
        "wsk": wsk_big.astype(jnp.float32),
        "wgo": wgo_big.astype(jnp.float32),
        "wl_sk": wl_sk.astype(jnp.float32),
        "wl_go": wl_go.astype(jnp.float32),
        "biases": biases.astype(jnp.float32),
    }


# ---------------- forward ----------------

def _pick_batch_tile(batch):
    # Largest power-of-two tile <= 1024 that divides the batch; 1024-row
    # flattened tiles (~12 MB double-buffered total) fit v7x's 32 MiB scoped
    # VMEM and are large enough to amortize per-grid-step overhead on v5e/v6e.
    for cand in (1024, 512, 256, 128, 64, 32, 16, 8):
        if cand <= batch and batch % cand == 0:
            return cand
    # TODO(synk): for very large batches not divisible by a power-of-two tile,
    # use cdiv grid + masked edge block instead of a single full-B block.
    return batch


def forward(packed, skaters, goalies):
    # skaters: (B, 2, P_s, 30), goalies: (B, 2, P_g, 12)  ->  (B, 3)
    B = skaters.shape[0]
    ks = skaters.shape[1] * skaters.shape[2] * skaters.shape[3]
    kg = goalies.shape[1] * goalies.shape[2] * goalies.shape[3]
    # Free reshapes of contiguous data: no team slices, no wrapper dtype cast.
    sk_flat = skaters.reshape(B, ks)
    go_flat = goalies.reshape(B, kg)

    tb = _pick_batch_tile(B)
    grid = (B // tb,)

    wsk, wgo = packed["wsk"], packed["wgo"]
    wl_sk, wl_go, biases = packed["wl_sk"], packed["wl_go"], packed["biases"]

    def const_spec(x):
        shp = x.shape
        return pl.BlockSpec(shp, lambda i, _s=shp: (0,) * len(_s))

    return pl.pallas_call(
        _fused_kernel,
        grid=grid,
        in_specs=[
            pl.BlockSpec((tb, ks), lambda i: (i, 0)),
            pl.BlockSpec((tb, kg), lambda i: (i, 0)),
            const_spec(wsk),
            const_spec(wgo),
            const_spec(wl_sk),
            const_spec(wl_go),
            const_spec(biases),
        ],
        out_specs=pl.BlockSpec((tb, NUM_CLASSES), lambda i: (i, 0)),
        out_shape=jax.ShapeDtypeStruct((B, NUM_CLASSES), jnp.float32),
        compiler_params=pltpu.CompilerParams(
            dimension_semantics=("parallel",)),
    )(sk_flat, go_flat, wsk, wgo, wl_sk, wl_go, biases)


def forward_ref(params, skaters, goalies):
    # Pure-JAX reference mirroring the PyTorch forward (conv -> mean -> cat
    # -> view -> tanh -> linear).
    sk = skaters.reshape(-1, skaters.shape[2], SKATER_STATS).astype(jnp.float32)
    go = goalies.reshape(-1, goalies.shape[2], GOALIE_STATS).astype(jnp.float32)
    sk_f = jnp.mean(jnp.einsum("nps,cs->npc", sk, params["conv_skater_w"])
                    + params["conv_skater_b"], axis=1)
    go_f = jnp.mean(jnp.einsum("nps,cs->npc", go, params["conv_goalie_w"])
                    + params["conv_goalie_b"], axis=1)
    feats = jnp.concatenate([sk_f, go_f], axis=1).reshape(-1, FEAT_LEN)
    return jnp.tanh(feats) @ params["lin_w"].T + params["lin_b"]


if __name__ == "__main__":
    key = jax.random.PRNGKey(0)
    kp, kx, kg = jax.random.split(key, 3)
    params = init_params(kp)

    B, P_SKATERS, P_GOALIES = 2, 18, 2
    skaters = jax.random.normal(kx, (B, 2, P_SKATERS, SKATER_STATS), jnp.float32)
    goalies = jax.random.normal(kg, (B, 2, P_GOALIES, GOALIE_STATS), jnp.float32)

    packed = pack_params(params, P_SKATERS, P_GOALIES)
    out = forward(packed, skaters, goalies)
    out = jax.block_until_ready(out)

    ref = forward_ref(params, skaters, goalies)
    assert out.shape == (B, NUM_CLASSES)
    np.testing.assert_allclose(np.asarray(out), np.asarray(ref),
                               rtol=2e-4, atol=2e-4)
    print("KERNEL_OK")
</pallas_src>

<mosaic_0001>
module attributes {stable_mosaic.version = 11 : i64} {
  func.func @_fused_kernel(%arg0: i32, %arg1: memref<2x1080xf32, #tpu.memory_space<vmem>>, %arg2: memref<2x48xf32, #tpu.memory_space<vmem>>, %arg3: memref<1080x20xf32, #tpu.memory_space<vmem>>, %arg4: memref<48x8xf32, #tpu.memory_space<vmem>>, %arg5: memref<20x3xf32, #tpu.memory_space<vmem>>, %arg6: memref<8x3xf32, #tpu.memory_space<vmem>>, %arg7: memref<1x31xf32, #tpu.memory_space<vmem>>, %arg8: memref<2x3xf32, #tpu.memory_space<vmem>>) attributes {dimension_semantics = [#tpu.dimension_semantics<parallel>], iteration_bounds = array<i64: 1>, scalar_prefetch = 0 : i64, scratch_operands = 0 : i64, tpu.core_type = #tpu.core_type<tc>, window_params = [{transform_indices = @transform_0, window_bounds = array<i64: 2, 1080>}, {transform_indices = @transform_1, window_bounds = array<i64: 2, 48>}, {pipeline_mode = #tpu.pipeline_mode<synchronous>, transform_indices = @transform_2, window_bounds = array<i64: 1080, 20>}, {pipeline_mode = #tpu.pipeline_mode<synchronous>, transform_indices = @transform_3, window_bounds = array<i64: 48, 8>}, {pipeline_mode = #tpu.pipeline_mode<synchronous>, transform_indices = @transform_4, window_bounds = array<i64: 20, 3>}, {pipeline_mode = #tpu.pipeline_mode<synchronous>, transform_indices = @transform_5, window_bounds = array<i64: 8, 3>}, {pipeline_mode = #tpu.pipeline_mode<synchronous>, transform_indices = @transform_6, window_bounds = array<i64: 1, 31>}, {transform_indices = @transform_7, window_bounds = array<i64: 2, 3>}]} {
    %c0 = arith.constant 0 : index
    %c0_0 = arith.constant 0 : index
    %0 = vector.load %arg7[%c0, %c0_0] : memref<1x31xf32, #tpu.memory_space<vmem>>, vector<1x31xf32>
    %1 = vector.extract_strided_slice %0 {offsets = [0, 0], sizes = [1, 20], strides = [1, 1]} : vector<1x31xf32> to vector<1x20xf32>
    %2 = vector.extract_strided_slice %0 {offsets = [0, 20], sizes = [1, 8], strides = [1, 1]} : vector<1x31xf32> to vector<1x8xf32>
    %3 = vector.extract_strided_slice %0 {offsets = [0, 28], sizes = [1, 3], strides = [1, 1]} : vector<1x31xf32> to vector<1x3xf32>
    %c0_1 = arith.constant 0 : index
    %c0_2 = arith.constant 0 : index
    %4 = vector.load %arg1[%c0_1, %c0_2] : memref<2x1080xf32, #tpu.memory_space<vmem>>, vector<2x1080xf32>
    %c0_3 = arith.constant 0 : index
    %c0_4 = arith.constant 0 : index
    %5 = vector.load %arg2[%c0_3, %c0_4] : memref<2x48xf32, #tpu.memory_space<vmem>>, vector<2x48xf32>
    %c0_5 = arith.constant 0 : index
    %c0_6 = arith.constant 0 : index
    %6 = vector.load %arg3[%c0_5, %c0_6] : memref<1080x20xf32, #tpu.memory_space<vmem>>, vector<1080x20xf32>
    %cst = arith.constant dense<0.000000e+00> : vector<2x20xf32>
    %7 = tpu.matmul %4, %6, %cst {dimension_numbers = #tpu.dot_dimension_numbers<[1], [0], [0], [1], [0, 0, 1, 1], [], []>} : vector<2x1080xf32>, vector<1080x20xf32>, vector<2x20xf32> -> vector<2x20xf32>
    %8 = vector.broadcast %1 : vector<1x20xf32> to vector<2x20xf32>
    %9 = arith.addf %7, %8 : vector<2x20xf32>
    %10 = math.tanh %9 : vector<2x20xf32>
    %c0_7 = arith.constant 0 : index
    %c0_8 = arith.constant 0 : index
    %11 = vector.load %arg4[%c0_7, %c0_8] : memref<48x8xf32, #tpu.memory_space<vmem>>, vector<48x8xf32>
    %cst_9 = arith.constant dense<0.000000e+00> : vector<2x8xf32>
    %12 = tpu.matmul %5, %11, %cst_9 {dimension_numbers = #tpu.dot_dimension_numbers<[1], [0], [0], [1], [0, 0, 1, 1], [], []>} : vector<2x48xf32>, vector<48x8xf32>, vector<2x8xf32> -> vector<2x8xf32>
    %13 = vector.broadcast %2 : vector<1x8xf32> to vector<2x8xf32>
    %14 = arith.addf %12, %13 : vector<2x8xf32>
    %15 = math.tanh %14 : vector<2x8xf32>
    %c0_10 = arith.constant 0 : index
    %c0_11 = arith.constant 0 : index
    %16 = vector.load %arg5[%c0_10, %c0_11] : memref<20x3xf32, #tpu.memory_space<vmem>>, vector<20x3xf32>
    %cst_12 = arith.constant dense<0.000000e+00> : vector<2x3xf32>
    %17 = tpu.matmul %10, %16, %cst_12 {dimension_numbers = #tpu.dot_dimension_numbers<[1], [0], [0], [1], [0, 0, 1, 1], [], []>} : vector<2x20xf32>, vector<20x3xf32>, vector<2x3xf32> -> vector<2x3xf32>
    %c0_13 = arith.constant 0 : index
    %c0_14 = arith.constant 0 : index
    %18 = vector.load %arg6[%c0_13, %c0_14] : memref<8x3xf32, #tpu.memory_space<vmem>>, vector<8x3xf32>
    %cst_15 = arith.constant dense<0.000000e+00> : vector<2x3xf32>
    %19 = tpu.matmul %15, %18, %cst_15 {dimension_numbers = #tpu.dot_dimension_numbers<[1], [0], [0], [1], [0, 0, 1, 1], [], []>} : vector<2x8xf32>, vector<8x3xf32>, vector<2x3xf32> -> vector<2x3xf32>
    %20 = arith.addf %17, %19 : vector<2x3xf32>
    %21 = vector.broadcast %3 : vector<1x3xf32> to vector<2x3xf32>
    %22 = arith.addf %20, %21 : vector<2x3xf32>
    %c0_16 = arith.constant 0 : index
    %c0_17 = arith.constant 0 : index
    %23 = vector.load %arg8[%c0_16, %c0_17] : memref<2x3xf32, #tpu.memory_space<vmem>>, vector<2x3xf32>
    tpu.vector_store %arg8[%c0_16, %c0_17], %22 {strides = array<i32>} : memref<2x3xf32, #tpu.memory_space<vmem>>, vector<2x3xf32>,
    return
  }
  func.func @transform_0(%arg0: i32) -> (i32, i32) {
    %c0_i32 = arith.constant 0 : i32
    %c0_i32_0 = arith.constant 0 : i32
    return %arg0, %c0_i32 : i32, i32
  }
  func.func @transform_1(%arg0: i32) -> (i32, i32) {
    %c0_i32 = arith.constant 0 : i32
    %c0_i32_0 = arith.constant 0 : i32
    return %arg0, %c0_i32 : i32, i32
  }
  func.func @transform_2(%arg0: i32) -> (i32, i32) {
    %c0_i32 = arith.constant 0 : i32
    %c0_i32_0 = arith.constant 0 : i32
    %c0_i32_1 = arith.constant 0 : i32
    return %c0_i32, %c0_i32_0 : i32, i32
  }
  func.func @transform_3(%arg0: i32) -> (i32, i32) {
    %c0_i32 = arith.constant 0 : i32
    %c0_i32_0 = arith.constant 0 : i32
    %c0_i32_1 = arith.constant 0 : i32
    return %c0_i32, %c0_i32_0 : i32, i32
  }
  func.func @transform_4(%arg0: i32) -> (i32, i32) {
    %c0_i32 = arith.constant 0 : i32
    %c0_i32_0 = arith.constant 0 : i32
    %c0_i32_1 = arith.constant 0 : i32
    return %c0_i32, %c0_i32_0 : i32, i32
  }
  func.func @transform_5(%arg0: i32) -> (i32, i32) {
    %c0_i32 = arith.constant 0 : i32
    %c0_i32_0 = arith.constant 0 : i32
    %c0_i32_1 = arith.constant 0 : i32
    return %c0_i32, %c0_i32_0 : i32, i32
  }
  func.func @transform_6(%arg0: i32) -> (i32, i32) {
    %c0_i32 = arith.constant 0 : i32
    %c0_i32_0 = arith.constant 0 : i32
    %c0_i32_1 = arith.constant 0 : i32
    return %c0_i32, %c0_i32_0 : i32, i32
  }
  func.func @transform_7(%arg0: i32) -> (i32, i32) {
    %c0_i32 = arith.constant 0 : i32
    %c0_i32_0 = arith.constant 0 : i32
    return %arg0, %c0_i32 : i32, i32
  }
}

</mosaic_0001>

<bundles_post_ra>
// kernel: tpu_custom_call.1
= control target key start
LH: loop header
LB: loop body
LE: loop exit
PB: predicated region body
PF: predicated region fallthrough
CT: control target
= control target key end

     0   :  { %s1025_s0 = inlined_call_operand.vmem [shape: f32[2,1080], index: 0, kind: input, shape index: {}]   ;;  %s1026_s1 = inlined_call_operand.vmem [shape: f32[2,48], index: 1, kind: input, shape index: {}]   ;;  %s1027_s2 = inlined_call_operand.vmem [shape: f32[1080,20], index: 2, kind: input, shape index: {}]   ;;  %s1028_s3 = inlined_call_operand.vmem [shape: f32[48,8], index: 3, kind: input, shape index: {}]   ;;  %s1029_s4 = inlined_call_operand.vmem [shape: f32[20,3], index: 4, kind: input, shape index: {}]   ;;  %s1030_s5 = inlined_call_operand.vmem [shape: f32[8,3], index: 5, kind: input, shape index: {}]   ;;  %s1031_s6 = inlined_call_operand.vmem [shape: f32[1,31], index: 6, kind: input, shape index: {}]   ;;  %s1032_s7 = inlined_call_operand.hbm [shape: f32[2,3], index: 7, kind: output, shape index: {}]  }
   0x1   :  { %v47_v0 = vld [vmem:[%s1027_s2 + $0x78] sm:$0xff]  ;;  %v46_v2 = vld [vmem:[%s1027_s2 + $0x70] sm:$0xff]  ;;  %v45_v6 = vld [vmem:[%s1027_s2 + $0x68] sm:$0xff] }
   0x2   :  { %v79_v1 = vld [vmem:[%s1027_s2 + $0x178] sm:$0xff]  ;;  %197 = vmatpush.msra.mxu0 %v47_v0  ;;  %v78_v4 = vld [vmem:[%s1027_s2 + $0x170] sm:$0xff]  ;;  %v77_v8 = vld [vmem:[%s1027_s2 + $0x168] sm:$0xff] }
   0x3   :  { %237 = vmatpush.msra.mxu2 %v79_v1  ;;  %v63_v3 = vld [vmem:[%s1027_s2 + $0xf8] sm:$0xff]  ;;  %v62_v7 = vld [vmem:[%s1027_s2 + $0xf0] sm:$0xff]  ;;  %v61_v10 = vld [vmem:[%s1027_s2 + $0xe8] sm:$0xff] }
   0x4   :  { %v95_v5 = vld [vmem:[%s1027_s2 + $0x1f8] sm:$0xff]  ;;  %217 = vmatpush.msra.mxu1 %v63_v3  ;;  %198 = vmatpush.msra.mxu0 %v46_v2  ;;  %v94_v9 = vld [vmem:[%s1027_s2 + $0x1f0] sm:$0xff]  ;;  %v44_v11 = vld [vmem:[%s1027_s2 + $0x60] sm:$0xff] }
   0x5   :  { %257 = vmatpush.msra.mxu3 %v95_v5  ;;  %238 = vmatpush.msra.mxu2 %v78_v4  ;;  %v76_v12 = vld [vmem:[%s1027_s2 + $0x160] sm:$0xff]  ;;  %v93_v13 = vld [vmem:[%s1027_s2 + $0x1e8] sm:$0xff]  ;;  %v43_v16 = vld [vmem:[%s1027_s2 + $0x58] sm:$0xff] }
   0x6   :  { %218 = vmatpush.msra.mxu1 %v62_v7  ;;  %199 = vmatpush.msra.mxu0 %v45_v6  ;;  %v60_v14 = vld [vmem:[%s1027_s2 + $0xe0] sm:$0xff]  ;;  %v75_v17 = vld [vmem:[%s1027_s2 + $0x158] sm:$0xff]  ;;  %v42_v20 = vld [vmem:[%s1027_s2 + $0x50] sm:$0xff] }
   0x7   :  { %258 = vmatpush.msra.mxu3 %v94_v9  ;;  %239 = vmatpush.msra.mxu2 %v77_v8  ;;  %v92_v15 = vld [vmem:[%s1027_s2 + $0x1e0] sm:$0xff]  ;;  %v59_v18 = vld [vmem:[%s1027_s2 + $0xd8] sm:$0xff]  ;;  %v74_v21 = vld [vmem:[%s1027_s2 + $0x150] sm:$0xff] }
   0x8   :  { %219 = vmatpush.msra.mxu1 %v61_v10  ;;  %200 = vmatpush.msra.mxu0 %v44_v11  ;;  %v91_v19 = vld [vmem:[%s1027_s2 + $0x1d8] sm:$0xff]  ;;  %v58_v22 = vld [vmem:[%s1027_s2 + $0xd0] sm:$0xff]  ;;  %v41_v24 = vld [vmem:[%s1027_s2 + $0x48] sm:$0xff] }
   0x9   :  { %259 = vmatpush.msra.mxu3 %v93_v13  ;;  %240 = vmatpush.msra.mxu2 %v76_v12  ;;  %v90_v23 = vld [vmem:[%s1027_s2 + $0x1d0] sm:$0xff]  ;;  %v73_v25 = vld [vmem:[%s1027_s2 + $0x148] sm:$0xff]  ;;  %v40_v28 = vld [vmem:[%s1027_s2 + $0x40] sm:$0xff] }
   0xa   :  { %220 = vmatpush.msra.mxu1 %v60_v14  ;;  %201 = vmatpush.msra.mxu0 %v43_v16  ;;  %v57_v26 = vld [vmem:[%s1027_s2 + $0xc8] sm:$0xff]  ;;  %v72_v29 = vld [vmem:[%s1027_s2 + $0x140] sm:$0xff]  ;;  %v39_v32 = vld [vmem:[%s1027_s2 + $0x38] sm:$0xff] }
   0xb   :  { %260 = vmatpush.msra.mxu3 %v92_v15  ;;  %241 = vmatpush.msra.mxu2 %v75_v17  ;;  %v89_v27 = vld [vmem:[%s1027_s2 + $0x1c8] sm:$0xff]  ;;  %v56_v30 = vld [vmem:[%s1027_s2 + $0xc0] sm:$0xff]  ;;  %v71_v33 = vld [vmem:[%s1027_s2 + $0x138] sm:$0xff] }
   0xc   :  { %221 = vmatpush.msra.mxu1 %v59_v18  ;;  %202 = vmatpush.msra.mxu0 %v42_v20  ;;  %v88_v31 = vld [vmem:[%s1027_s2 + $0x1c0] sm:$0xff]  ;;  %v55_v34 = vld [vmem:[%s1027_s2 + $0xb8] sm:$0xff]  ;;  %v38_v36 = vld [vmem:[%s1027_s2 + $0x30] sm:$0xff] }
   0xd   :  { %261 = vmatpush.msra.mxu3 %v91_v19  ;;  %242 = vmatpush.msra.mxu2 %v74_v21  ;;  %v87_v35 = vld [vmem:[%s1027_s2 + $0x1b8] sm:$0xff]  ;;  %v70_v37 = vld [vmem:[%s1027_s2 + $0x130] sm:$0xff]  ;;  %v37_v40 = vld [vmem:[%s1027_s2 + $0x28] sm:$0xff] }
   0xe   :  { %222 = vmatpush.msra.mxu1 %v58_v22  ;;  %203 = vmatpush.msra.mxu0 %v41_v24  ;;  %v54_v38 = vld [vmem:[%s1027_s2 + $0xb0] sm:$0xff]  ;;  %v69_v41 = vld [vmem:[%s1027_s2 + $0x128] sm:$0xff]  ;;  %v36_v44 = vld [vmem:[%s1027_s2 + $0x20] sm:$0xff] }
   0xf   :  { %262 = vmatpush.msra.mxu3 %v90_v23  ;;  %243 = vmatpush.msra.mxu2 %v73_v25  ;;  %v86_v39 = vld [vmem:[%s1027_s2 + $0x1b0] sm:$0xff]  ;;  %v53_v42 = vld [vmem:[%s1027_s2 + $0xa8] sm:$0xff]  ;;  %v68_v45 = vld [vmem:[%s1027_s2 + $0x120] sm:$0xff] }
  0x10   :  { %223 = vmatpush.msra.mxu1 %v57_v26  ;;  %204 = vmatpush.msra.mxu0 %v40_v28  ;;  %v85_v43 = vld [vmem:[%s1027_s2 + $0x1a8] sm:$0xff]  ;;  %v52_v46 = vld [vmem:[%s1027_s2 + $0xa0] sm:$0xff]  ;;  %v35_v48 = vld [vmem:[%s1027_s2 + $0x18] sm:$0xff] }
  0x11   :  { %263 = vmatpush.msra.mxu3 %v89_v27  ;;  %244 = vmatpush.msra.mxu2 %v72_v29  ;;  %v84_v47 = vld [vmem:[%s1027_s2 + $0x1a0] sm:$0xff]  ;;  %v67_v49 = vld [vmem:[%s1027_s2 + $0x118] sm:$0xff]  ;;  %v34_v52 = vld [vmem:[%s1027_s2 + $0x10] sm:$0xff] }
  0x12   :  { %224 = vmatpush.msra.mxu1 %v56_v30  ;;  %205 = vmatpush.msra.mxu0 %v39_v32  ;;  %v51_v50 = vld [vmem:[%s1027_s2 + $0x98] sm:$0xff]  ;;  %v66_v53 = vld [vmem:[%s1027_s2 + $0x110] sm:$0xff]  ;;  %v33_v56 = vld [vmem:[%s1027_s2 + $0x8] sm:$0xff] }
  0x13   :  { %264 = vmatpush.msra.mxu3 %v88_v31  ;;  %245 = vmatpush.msra.mxu2 %v71_v33  ;;  %v83_v51 = vld [vmem:[%s1027_s2 + $0x198] sm:$0xff]  ;;  %v50_v54 = vld [vmem:[%s1027_s2 + $0x90] sm:$0xff]  ;;  %v65_v57 = vld [vmem:[%s1027_s2 + $0x108] sm:$0xff] }
  0x14   :  { %225 = vmatpush.msra.mxu1 %v55_v34  ;;  %206 = vmatpush.msra.mxu0 %v38_v36  ;;  %v82_v55 = vld [vmem:[%s1027_s2 + $0x190] sm:$0xff]  ;;  %v49_v58 = vld [vmem:[%s1027_s2 + $0x88] sm:$0xff]  ;;  %v32_v60 = vld [vmem:[%s1027_s2] sm:$0xff] }
  0x15   :  { %265 = vmatpush.msra.mxu3 %v87_v35  ;;  %246 = vmatpush.msra.mxu2 %v70_v37  ;;  %v81_v59 = vld [vmem:[%s1027_s2 + $0x188] sm:$0xff]  ;;  %v64_v61 = vld [vmem:[%s1027_s2 + $0x100] sm:$0xff]  ;;  %v111_v62 = vld [vmem:[%s1027_s2 + $0x278] sm:$0xff] }
  0x16   :  { %226 = vmatpush.msra.mxu1 %v54_v38  ;;  %207 = vmatpush.msra.mxu0 %v37_v40  ;;  %v48_v63 = vld [vmem:[%s1027_s2 + $0x80] sm:$0xff]  ;;  %v143_v0 = vld [vmem:[%s1027_s2 + $0x378] sm:$0xff]  ;;  %v110_v2 = vld [vmem:[%s1027_s2 + $0x270] sm:$0xff] }
  0x17   :  { %266 = vmatpush.msra.mxu3 %v86_v39  ;;  %247 = vmatpush.msra.mxu2 %v69_v41  ;;  %v80_v1 = vld [vmem:[%s1027_s2 + $0x180] sm:$0xff]  ;;  %v127_v3 = vld [vmem:[%s1027_s2 + $0x2f8] sm:$0xff]  ;;  %v142_v4 = vld [vmem:[%s1027_s2 + $0x370] sm:$0xff] }
  0x18   :  { %227 = vmatpush.msra.mxu1 %v53_v42  ;;  %208 = vmatpush.msra.mxu0 %v36_v44  ;;  %v159_v5 = vld [vmem:[%s1027_s2 + $0x3f8] sm:$0xff]  ;;  %v109_v6 = vld [vmem:[%s1027_s2 + $0x268] sm:$0xff]  ;;  %v126_v7 = vld [vmem:[%s1027_s2 + $0x2f0] sm:$0xff] }
  0x19   :  { %267 = vmatpush.msra.mxu3 %v85_v43  ;;  %248 = vmatpush.msra.mxu2 %v68_v45  ;;  %v141_v8 = vld [vmem:[%s1027_s2 + $0x368] sm:$0xff]  ;;  %v158_v9 = vld [vmem:[%s1027_s2 + $0x3f0] sm:$0xff]  ;;  %v108_v10 = vld [vmem:[%s1027_s2 + $0x260] sm:$0xff] }
  0x1a   :  { %228 = vmatpush.msra.mxu1 %v52_v46  ;;  %209 = vmatpush.msra.mxu0 %v35_v48  ;;  %v125_v11 = vld [vmem:[%s1027_s2 + $0x2e8] sm:$0xff]  ;;  %v140_v12 = vld [vmem:[%s1027_s2 + $0x360] sm:$0xff]  ;;  %v107_v15 = vld [vmem:[%s1027_s2 + $0x258] sm:$0xff] }
  0x1b   :  { %268 = vmatpush.msra.mxu3 %v84_v47  ;;  %249 = vmatpush.msra.mxu2 %v67_v49  ;;  %v157_v13 = vld [vmem:[%s1027_s2 + $0x3e8] sm:$0xff]  ;;  %v28_v14 = vld [vmem:[%s1025_s0] sm:$0xff]  ;;  %v139_v17 = vld [vmem:[%s1027_s2 + $0x358] sm:$0xff] }
  0x1c   :  { %229 = vmatpush.msra.mxu1 %v51_v50  ;;  %210 = vmatpush.msra.mxu0 %v34_v52  ;;  %v124_v16 = vld [vmem:[%s1027_s2 + $0x2e0] sm:$0xff]  ;;  %173 = vst [vmem:[#allocation1] ss:$4 sm:$0xff] %v28_v14  ;;  %v106_v19 = vld [vmem:[%s1027_s2 + $0x250] sm:$0xff]  ;;  %v123_v20 = vld [vmem:[%s1027_s2 + $0x2d8] sm:$0xff] }
  0x1d   :  { %269 = vmatpush.msra.mxu3 %v83_v51  ;;  %250 = vmatpush.msra.mxu2 %v66_v53  ;;  %v156_v18 = vld [vmem:[%s1027_s2 + $0x3e0] sm:$0xff]  ;;  %v138_v21 = vld [vmem:[%s1027_s2 + $0x350] sm:$0xff]  ;;  %v155_v22 = vld [vmem:[%s1027_s2 + $0x3d8] sm:$0xff] }
  0x1e   :  { %230 = vmatpush.msra.mxu1 %v50_v54  ;;  %211 = vmatpush.msra.mxu0 %v33_v56  ;;  %v105_v23 = vld [vmem:[%s1027_s2 + $0x248] sm:$0xff]  ;;  %v122_v24 = vld [vmem:[%s1027_s2 + $0x2d0] sm:$0xff]  ;;  %v104_v27 = vld [vmem:[%s1027_s2 + $0x240] sm:$0xff] }
  0x1f   :  { %270 = vmatpush.msra.mxu3 %v82_v55  ;;  %251 = vmatpush.msra.mxu2 %v65_v57  ;;  %v137_v25 = vld [vmem:[%s1027_s2 + $0x348] sm:$0xff]  ;;  %v154_v26 = vld [vmem:[%s1027_s2 + $0x3d0] sm:$0xff]  ;;  %v136_v29 = vld [vmem:[%s1027_s2 + $0x340] sm:$0xff] }
  0x20   :  { %231 = vmatpush.msra.mxu1 %v49_v58  ;;  %212 = vmatpush.msra.mxu0 %v32_v60  ;;  %v121_v28 = vld [vmem:[%s1027_s2 + $0x2c8] sm:$0xff]  ;;  %v103_v31 = vld [vmem:[%s1027_s2 + $0x238] sm:$0xff]  ;;  %v120_v32 = vld [vmem:[%s1027_s2 + $0x2c0] sm:$0xff] }
  0x21   :  { %271 = vmatpush.msra.mxu3 %v81_v59  ;;  %252 = vmatpush.msra.mxu2 %v64_v61  ;;  %v153_v30 = vld [vmem:[%s1027_s2 + $0x3c8] sm:$0xff]  ;;  %v30_v33 = vld [vmem:[%s1025_s0 + $0x10] sm:$0x3]  ;;  %v135_v39 = vld [vmem:[%s1027_s2 + $0x338] sm:$0xff] }
  0x22   :  { %277 = vmatpush.msrb.mxu0 %v111_v62  ;;  %232 = vmatpush.msra.mxu1 %v48_v63  ;;  %v29_v34 = vld [vmem:[%s1025_s0 + $0x8] sm:$0xff]  ;;  %v152_v40 = vld [vmem:[%s1027_s2 + $0x3c0] sm:$0xff]  ;;  %v102_v41 = vld [vmem:[%s1027_s2 + $0x230] sm:$0xff] }
  0x23   :  { %317 = vmatpush.msrb.mxu2 %v143_v0  ;;  %272 = vmatpush.msra.mxu3 %v80_v1  ;;  %v178_v35 = vld.sshfl [vmem:[#allocation1 + $0x10] sm:$0xff pattern:$0x73625140]  ;;  %v176_v36 = vld.sshfl [vmem:[#allocation1] sm:$0xff pattern:$0x73625140] }
  0x24   :  { %278 = vmatpush.msrb.mxu0 %v110_v2  ;;  %297 = vmatpush.msrb.mxu1 %v127_v3  ;;  %v179_v37 = vld.sshfl [vmem:[#allocation1 + $0x18] sm:$0xff pattern:$0x73625140]  ;;  %v177_v38 = vld.sshfl [vmem:[#allocation1 + $0x8] sm:$0xff pattern:$0x73625140] }
  0x25   :  { %318 = vmatpush.msrb.mxu2 %v142_v4  ;;  %337 = vmatpush.msrb.mxu3 %v159_v5  ;;  %184 = vst [vmem:[#allocation1] ss:$4 sm:$0xff] %v30_v33  ;;  %v119_v42 = vld [vmem:[%s1027_s2 + $0x2b8] sm:$0xff]  ;;  %v134_v43 = vld [vmem:[%s1027_s2 + $0x330] sm:$0xff]  ;;  %v101_v45 = vld [vmem:[%s1027_s2 + $0x228] sm:$0xff] }
  0x26   :  { %279 = vmatpush.msrb.mxu0 %v109_v6  ;;  %298 = vmatpush.msrb.mxu1 %v126_v7  ;;  %175 = vst [vmem:[#allocation1 + $0x20] ss:$4 sm:$0xff] %v29_v34  ;;  %v151_v44 = vld [vmem:[%s1027_s2 + $0x3b8] sm:$0xff]  ;;  %v118_v46 = vld [vmem:[%s1027_s2 + $0x2b0] sm:$0xff]  ;;  %v133_v47 = vld [vmem:[%s1027_s2 + $0x328] sm:$0xff] }
  0x27   :  { %319 = vmatpush.msrb.mxu2 %v141_v8  ;;  %338 = vmatpush.msrb.mxu3 %v158_v9  ;;  %v150_v48 = vld [vmem:[%s1027_s2 + $0x3b0] sm:$0xff]  ;;  %v100_v49 = vld [vmem:[%s1027_s2 + $0x220] sm:$0xff]  ;;  %v117_v50 = vld [vmem:[%s1027_s2 + $0x2a8] sm:$0xff] }
  0x28   :  { %280 = vmatpush.msrb.mxu0 %v108_v10  ;;  %299 = vmatpush.msrb.mxu1 %v125_v11 }
  0x29   :  { %320 = vmatpush.msrb.mxu2 %v140_v12  ;;  %339 = vmatpush.msrb.mxu3 %v157_v13 }
  0x2a   :  { %281 = vmatpush.msrb.mxu0 %v107_v15  ;;  %300 = vmatpush.msrb.mxu1 %v124_v16 }
  0x2b   :  { %321 = vmatpush.msrb.mxu2 %v139_v17  ;;  %340 = vmatpush.msrb.mxu3 %v156_v18 }
  0x2c   :  { %282 = vmatpush.msrb.mxu0 %v106_v19  ;;  %301 = vmatpush.msrb.mxu1 %v123_v20 }
  0x2d   :  { %322 = vmatpush.msrb.mxu2 %v138_v21  ;;  %341 = vmatpush.msrb.mxu3 %v155_v22 }
  0x2e   :  { %283 = vmatpush.msrb.mxu0 %v105_v23  ;;  %302 = vmatpush.msrb.mxu1 %v122_v24 }
  0x2f   :  { %323 = vmatpush.msrb.mxu2 %v137_v25  ;;  %342 = vmatpush.msrb.mxu3 %v154_v26 }
  0x30   :  { %284 = vmatpush.msrb.mxu0 %v104_v27  ;;  %303 = vmatpush.msrb.mxu1 %v121_v28 }
  0x31   :  { %324 = vmatpush.msrb.mxu2 %v136_v29  ;;  %343 = vmatpush.msrb.mxu3 %v153_v30 }
  0x32   :  { %285 = vmatpush.msrb.mxu0 %v103_v31  ;;  %304 = vmatpush.msrb.mxu1 %v120_v32 }
  0x33   :  { %325 = vmatpush.msrb.mxu2 %v135_v39  ;;  %344 = vmatpush.msrb.mxu3 %v152_v40 }
  0x34   :  { %286 = vmatpush.msrb.mxu0 %v102_v41  ;;  %305 = vmatpush.msrb.mxu1 %v119_v42 }
  0x35   :  { %326 = vmatpush.msrb.mxu2 %v134_v43  ;;  %345 = vmatpush.msrb.mxu3 %v151_v44 }
  0x36   :  { %12 = vsyncpa [#allocation3], 0  ;;  %287 = vmatpush.msrb.mxu0 %v101_v45  ;;  %306 = vmatpush.msrb.mxu1 %v118_v46  ;;  %v132_v51 = vld [vmem:[%s1027_s2 + $0x320] sm:$0xff]  ;;  %v149_v52 = vld [vmem:[%s1027_s2 + $0x3a8] sm:$0xff]  ;;  %s529_s25 = smov 108   ;;  %vm194_vm0 = vcmask 457728  }
  0x37   :  { %327 = vmatpush.msrb.mxu2 %v133_v47  ;;  %346 = vmatpush.msrb.mxu3 %v150_v48  ;;  %v99_v53 = vld [vmem:[%s1027_s2 + $0x218] sm:$0xff]  ;;  %v116_v54 = vld [vmem:[%s1027_s2 + $0x2a0] sm:$0xff]  ;;  %v98_v57 = vld [vmem:[%s1027_s2 + $0x210] sm:$0xff]  ;;  %vm387_vm1 = vcmask 392192   ;;  %s530_s13 = smov 100   ;;  %vm444_vm2 = vcmask 1043456  }
  0x38   :  { %288 = vmatpush.msrb.mxu0 %v100_v49  ;;  %307 = vmatpush.msrb.mxu1 %v117_v50  ;;  %v131_v55 = vld [vmem:[%s1027_s2 + $0x318] sm:$0xff]  ;;  %v148_v56 = vld [vmem:[%s1027_s2 + $0x3a0] sm:$0xff]  ;;  %v130_v59 = vld [vmem:[%s1027_s2 + $0x310] sm:$0xff]  ;;  %vm440_vm3 = vcmask 162816   ;;  %vm416_vm4 = vcmask 64512   ;;  %s481_s20 = sshll.u32 %s1032_s7, 4  ;;  %s482_s20 = int_to_ptr.hbm [resolvable:$true] %s481_s20 }
  0x39   :  { %328 = vmatpush.msrb.mxu2 %v132_v51  ;;  %347 = vmatpush.msrb.mxu3 %v149_v52  ;;  %v115_v58 = vld [vmem:[%s1027_s2 + $0x298] sm:$0xff]  ;;  %v97_v61 = vld [vmem:[%s1027_s2 + $0x208] sm:$0xff]  ;;  %v114_v62 = vld [vmem:[%s1027_s2 + $0x290] sm:$0xff]  ;;  %vm472_vm5 = vcmask 17408  }
  0x3a   :  { %253 = vmatmul.f32.vlgmr.msra.gmra.mxu2 %v178_v35  ;;  %289 = vmatpush.msrb.mxu0 %v99_v53  ;;  %v147_v60 = vld [vmem:[%s1027_s2 + $0x398] sm:$0xff]  ;;  %v129_v63 = vld [vmem:[%s1027_s2 + $0x308] sm:$0xff]  ;;  %v146_v0 = vld [vmem:[%s1027_s2 + $0x390] sm:$0xff] }
  0x3b   :  { %308 = vmatpush.msrb.mxu1 %v116_v54  ;;  %329 = vmatpush.msrb.mxu2 %v131_v55  ;;  %v96_v1 = vld [vmem:[%s1027_s2 + $0x200] sm:$0xff]  ;;  %v113_v2 = vld [vmem:[%s1027_s2 + $0x288] sm:$0xff]  ;;  %v166_v5 = vld [vmem:[%s1027_s2 + $0x430] sm:$0xff] }
  0x3c   :  { %348 = vmatpush.msrb.mxu3 %v148_v56  ;;  %213 = vmatmul.f32.vlgmr.msra.gmra.mxu0 %v176_v36  ;;  %v128_v3 = vld [vmem:[%s1027_s2 + $0x300] sm:$0xff]  ;;  %v145_v4 = vld [vmem:[%s1027_s2 + $0x388] sm:$0xff]  ;;  %v182_v7 = vld.sshfl [vmem:[#allocation1 + $0x30] sm:$0xff pattern:$0x73625140] }
  0x3d   :  { %273 = vmatmul.f32.vlgmr.msra.gmra.mxu3 %v179_v37  ;;  %290 = vmatpush.msrb.mxu0 %v98_v57  ;;  %v112_v6 = vld [vmem:[%s1027_s2 + $0x280] sm:$0xff]  ;;  %v165_v9 = vld [vmem:[%s1027_s2 + $0x428] sm:$0xff]  ;;  %v183_v12 = vld.sshfl [vmem:[#allocation1 + $0x38] sm:$0xff pattern:$0x73625140] }
  0x3e   :  { %309 = vmatpush.msrb.mxu1 %v115_v58  ;;  %330 = vmatpush.msrb.mxu2 %v130_v59  ;;  %v144_v8 = vld [vmem:[%s1027_s2 + $0x380] sm:$0xff]  ;;  %v383_v10 = vld [vmem:[%s1028_s3 + $0x28] sm:$0xff]  ;;  %v163_v17 = vld [vmem:[%s1027_s2 + $0x418] sm:$0xff] }
  0x3f   :  { %349 = vmatpush.msrb.mxu3 %v147_v60  ;;  %233 = vmatmul.f32.vlgmr.msra.gmra.mxu1 %v177_v38  ;;  %v180_v11 = vld.sshfl [vmem:[#allocation1 + $0x20] sm:$0xff pattern:$0x73625140]  ;;  %v181_v16 = vld.sshfl [vmem:[#allocation1 + $0x28] sm:$0xff pattern:$0x73625140] }
  0x40   :  { %291 = vmatpush.msrb.mxu0 %v97_v61  ;;  %310 = vmatpush.msrb.mxu1 %v114_v62  ;;  %v164_v13 = vld [vmem:[%s1027_s2 + $0x420] sm:$0xff]  ;;  %v381_v18 = vld [vmem:[%s1028_s3 + $0x18] sm:$0xff]  ;;  %v162_v19 = vld [vmem:[%s1027_s2 + $0x410] sm:$0xff] }
  0x41   :  { %331 = vmatpush.msrb.mxu2 %v129_v63  ;;  %350 = vmatpush.msrb.mxu3 %v146_v0  ;;  %v382_v14 = vld [vmem:[%s1028_s3 + $0x20] sm:$0xff]  ;;  %v380_v20 = vld [vmem:[%s1028_s3 + $0x10] sm:$0xff]  ;;  %v161_v21 = vld [vmem:[%s1027_s2 + $0x408] sm:$0xff] }
  0x42   :  { %292 = vmatpush.msrb.mxu0 %v96_v1  ;;  %311 = vmatpush.msrb.mxu1 %v113_v2  ;;  %v498_v15 = vld [vmem:[%s1031_s6] ss:$0 sm:$0xff]  ;;  %v379_v22 = vld [vmem:[%s1028_s3 + $0x8] sm:$0xff]  ;;  %v414_v28 = vld [vmem:[%s1029_s4 + $0x10] sm:$0xf] }
  0x43   :  { %332 = vmatpush.msrb.mxu2 %v128_v3  ;;  %351 = vmatpush.msrb.mxu3 %v145_v4  ;;  %v160_v23 = vld [vmem:[%s1027_s2 + $0x400] sm:$0xff]  ;;  %v413_v29 = vld [vmem:[%s1029_s4 + $0x8] sm:$0xff] }
  0x44   :  { %366 = vmatpush.msra.mxu0 %v166_v5  ;;  %312 = vmatpush.msrb.mxu1 %v112_v6  ;;  %v378_v24 = vld [vmem:[%s1028_s3] sm:$0xff] }
  0x45   :  { %333 = vmatmul.f32.vlgmr.msrb.gmra.mxu2 %v182_v7  ;;  %352 = vmatpush.msrb.mxu3 %v144_v8  ;;  %v185_v25 = vld.sshfl [vmem:[#allocation1] sm:$0xff pattern:$0x73625140] }
  0x46   :  { %367 = vmatpush.msra.mxu0 %v165_v9  ;;  %401 = vmatpush.msra.mxu1 %v383_v10  ;;  %v31_v26 = vld [vmem:[%s1026_s1] sm:$0x3] }
  0x47   :  { %293 = vmatmul.f32.vlgmr.msrb.gmra.mxu0 %v180_v11  ;;  %353 = vmatmul.f32.vlgmr.msrb.gmra.mxu3 %v183_v12  ;;  %v415_v27 = vld [vmem:[%s1030_s5] sm:$0xff] }
  0x48   :  { %368 = vmatpush.msra.mxu0 %v164_v13  ;;  %402 = vmatpush.msra.mxu1 %v382_v14  ;;  %v412_v30 = vld [vmem:[%s1029_s4] sm:$0xff]  ;;  %s531_s4 = smov [#allocation2]  }
  0x49   :  { %313 = vmatmul.f32.vlgmr.msrb.gmra.mxu1 %v181_v16  ;;  %384 = vrot.lane.b32.xlu0 %v498_v15, %s529_s25  ;;  %s479_s5 = sshll.u32 %s531_s4, 4  ;;  %s480_s5 = int_to_ptr.vmem [resolvable:$true] %s479_s5 }
  0x4a   :  { %369 = vmatpush.msra.mxu0 %v163_v17  ;;  %403 = vmatpush.msra.mxu1 %v381_v18 }
  0x4b   :  { %435 = vmatpush.msra.mxu2 %v415_v27  ;;  %493 = vmatpush.msk.msra.mxu3 %vm444_vm2, %v414_v28 }
  0x4c   :  { %370 = vmatpush.msra.mxu0 %v162_v19  ;;  %404 = vmatpush.msra.mxu1 %v380_v20 }
  0x4d   :  { %462 = vmatpush.msra.mxu3 %v413_v29 }
  0x4e   :  { %371 = vmatpush.msra.mxu0 %v161_v21  ;;  %405 = vmatpush.msra.mxu1 %v379_v22 }
  0x4f   :  { %463 = vmatpush.msra.mxu3 %v412_v30 }
  0x50   :  { %372 = vmatpush.msra.mxu0 %v160_v23  ;;  %406 = vmatpush.msra.mxu1 %v378_v24 }
  0x51   :  { %490 = vmatmul.msk.f32.vlgmr.msra.gmra.mxu0 %vm194_vm0, %v185_v25  ;;  %491 = vmatmul.msk.f32.vlgmr.msra.gmra.mxu1 %vm387_vm1, %v31_v26 }
  0x52   :  { %468 = vrot.lane.b32.xlu0 %v498_v15, %s530_s13 }
  0xb9   :  { %v214_v31 = vpop.f32.mrf.mxu0 }
  0xba   :  { %v215_v32 = vadd.f32 %v498_v15, %v214_v31 }
  0xbb   :  { %v385_v46 = vpop.permute.xlu0 %384 }
  0xbc   :  { %v234_v33 = vpop.f32.mrf.mxu1 }
  0xbd   :  { %v235_v34 = vadd.f32 %v234_v33, %v215_v32  ;;  %v254_v35 = vpop.f32.mrf.mxu2 }
  0xbf   :  { %v255_v36 = vadd.f32 %v254_v35, %v235_v34 }
  0xc0   :  { %v274_v37 = vpop.f32.mrf.mxu3 }
  0xc1   :  { %v275_v38 = vadd.f32 %v274_v37, %v255_v36 }
  0xc4   :  { %v294_v39 = vpop.f32.mrf.mxu0  ;;  %v469_v56 = vpop.permute.xlu0 %468 }
  0xc5   :  { %v295_v40 = vadd.f32 %v294_v39, %v275_v38 }
  0xc6   :  { %v314_v41 = vpop.f32.mrf.mxu1 }
  0xc7   :  { %v315_v42 = vadd.f32 %v314_v41, %v295_v40 }
  0xc8   :  { %v334_v43 = vpop.f32.mrf.mxu2 }
  0xc9   :  { %v335_v44 = vadd.f32 %v334_v43, %v315_v42 }
  0xca   :  { %v354_v45 = vpop.f32.mrf.mxu3 }
  0xcb   :  { %v355_v47 = vadd.f32 %v354_v45, %v335_v44 }
  0xce   :  { %v374_v48 = vpop.f32.mrf.mxu0  ;;  %v408_v49 = vpop.f32.mrf.mxu1 }
  0xcf   :  { %v375_v50 = vadd.f32 %v374_v48, %v355_v47  ;;  %v409_v51 = vadd.f32 %v408_v49, %v385_v46 }
  0xd1   :  { %499 = vtanh.f32 %v375_v50 }
  0xd2   :  { %501 = vtanh.f32 %v409_v51 }
  0xd7   :  { %v500_v52 = vpop.eup %499 }
  0xd8   :  { %v502_v53 = vpop.eup %501  ;;  %494 = vmatmul.msk.f32.vlgmr.msra.gmra.mxu3 %vm440_vm3, %v500_v52 }
  0xd9   :  { %492 = vmatmul.msk.f32.vlgmr.msra.gmra.mxu2 %vm416_vm4, %v502_v53 }
 0x15b   :  { %v465_v54 = vpop.f32.mrf.mxu3 }
 0x15c   :  { %v437_v55 = vpop.f32.mrf.mxu2 }
 0x15d   :  { %v466_v57 = vadd.f32 %v465_v54, %v437_v55 }
 0x15f   :  { %v471_v58 = vadd.f32 %v469_v56, %v466_v57 }
 0x161   :  { %473 = vst.msk [vmem:[#allocation2] sm:$0x3] %vm472_vm5, %v471_v58 }
 0x162   :  { %484 = dma.vmem_to_hbm [thread:$0]  %s480_s5, 32, %s482_s20, [#allocation3]  }
 0x163   :  { %527 = dma.done.wait [#allocation3], 32  }
 0x164   :  { %528 = vsyncadd [#allocation3], 4294967264 }
 0x165   :  { %489 = vsyncpa [#allocation3], 1 }

</bundles_post_ra>
